<compile_context>
chip_gen: v5e
topology: v5e:2x2
jax: 0.10.0
libtpu: 0.0.40
codegen_flags: <defaults>
</compile_context>

<pallas_src>
import jax
import jax.numpy as jnp
from jax import lax
from jax.experimental import pallas as pl
from jax.experimental.pallas import tpu as pltpu

LN_EPS = 1e-5  # PyTorch nn.LayerNorm default eps


def _patch_embed_kernel(x_ref, g1_ref, b1_ref, w_ref, bias_ref,
                        g2_ref, b2_ref, pos_ref, cls_ref, o_ref):
    """One grid step: BB images x TILE sequence rows.

    x_ref : (BB, T, Dp) bf16 rows of [CLS-dummy, patch_0 .. patch_{N-1}]
    o_ref : (BB, T, Hd) f32
    """
    n_imgs = x_ref.shape[0]

    pos = pos_ref[...]                       # (T, Hd)  f32
    g1 = g1_ref[...]                         # (1, Dp)
    b1 = b1_ref[...]
    g2 = g2_ref[...]                         # (1, Hd)
    b2 = b2_ref[...]
    bias = bias_ref[...]                     # (1, Hd)
    w = w_ref[...]                           # (Dp, Hd) bf16

    # Static unroll over the images in this block: every op stays 2-D so the
    # lowering is simple; the per-step pipeline overhead is amortized over BB
    # images while the DMA still moves one big (BB, T, Dp) block.
    for bb in range(n_imgs):
        x = x_ref[bb].astype(jnp.float32)                    # (T, Dp) f32

        # LayerNorm over patch_dim (two-pass variance, f32)
        mu = jnp.mean(x, axis=-1, keepdims=True)
        xc = x - mu
        var = jnp.mean(xc * xc, axis=-1, keepdims=True)
        xn = xc * lax.rsqrt(var + LN_EPS)
        xn = xn * g1 + b1                                    # (T, Dp)

        # Linear(patch_dim -> hidden): bf16 operands on the MXU, f32 accumulator.
        y = jnp.dot(xn.astype(jnp.bfloat16), w,
                    preferred_element_type=jnp.float32)
        y = y + bias                                         # (T, Hd) f32

        # LayerNorm over hidden (f32)
        mu2 = jnp.mean(y, axis=-1, keepdims=True)
        yc = y - mu2
        var2 = jnp.mean(yc * yc, axis=-1, keepdims=True)
        yn = yc * lax.rsqrt(var2 + LN_EPS)
        yn = yn * g2 + b2                                    # (T, Hd)

        # + positional embedding.  pos row 0 (the CLS slot) is zero-padded and
        # is fully overwritten below, so it never reaches the output.
        o_ref[bb] = (yn + pos).astype(o_ref.dtype)

    # CLS token lives in global row 0 == local row 0 of row-tile 0.
    @pl.when(pl.program_id(0) == 0)
    def _():
        cls_row = cls_ref[...].astype(o_ref.dtype)           # (1, Hd)
        for bb in range(n_imgs):
            o_ref[bb, 0:1, :] = cls_row


def _vmem_limit_bytes():
    """~75% of per-core VMEM, capped at 100 MiB (v7x ~48 MiB, v5e/v6e ~96 MiB)."""
    cap = 64 * 1024 * 1024          # conservative fallback = v7x per-TC VMEM
    try:
        cap = int(pltpu.get_tpu_info().vmem_capacity_bytes)
    except Exception:
        pass
    return int(min(cap * 3 // 4, 100 * 1024 * 1024))


def _choose_blocks(B, S, Dp, Hd, vmem_limit):
    """Pick (row_tile, num_row_tiles, images_per_step) under a VMEM budget."""
    # Row tile: whole sequence when short (always tile-legal since it equals the
    # full dim); otherwise 512 rows (multiple of 8/16 sublanes) -- big enough to
    # amortize the ~0.35us/step overhead, small enough for v7x's 64 MiB VMEM.
    tile = S if S <= 512 else 512
    nt = -(-S // tile)

    def footprint(bb):
        x_blk = bb * tile * Dp * 2                # bf16 input block
        o_blk = bb * tile * Hd * 4                # f32 output block
        pos_blk = tile * Hd * 4
        interm = bb * tile * (Dp + Hd) * 4 * 2    # f32 LN/matmul temporaries (approx)
        return 2 * (x_blk + o_blk + pos_blk) + interm  # double-buffered blocks

    budget = vmem_limit // 2                      # headroom for weight/params/scratch
    bb = 1
    for cand in (8, 4, 2):
        if cand <= B and B % cand == 0 and footprint(cand) <= budget:
            bb = cand
            break
    return tile, nt, bb


def _resident_spec(shape, index_map):
    """BlockSpec for grid-invariant operands; single-buffered when supported."""
    if hasattr(pl, "Buffered"):
        try:
            return pl.BlockSpec(shape, index_map, pipeline_mode=pl.Buffered(1))
        except Exception:
            pass
    return pl.BlockSpec(shape, index_map)


def patch_embedding_forward(pixel_values, params, *, patch_size):
    """pixel_values: (B, C, H, W). Returns (B, 1 + num_patches, hidden_size) f32."""
    B, C, Himg, Wimg = pixel_values.shape
    p = patch_size
    h, w = Himg // p, Wimg // p
    N = h * w
    Dp = C * p * p
    Hd = params["w"].shape[1]
    S = N + 1                                    # CLS + patches

    # einops 'b c (h p1) (w p2) -> b (h w) (p1 p2 c)' with one zero row per image
    # prepended (the CLS slot), materialized ONCE in bf16: halves the dominant
    # HBM input stream and keeps the pallas_call input contiguous.
    xp = pixel_values.reshape(B, C, h, p, w, p)
    xp = jnp.transpose(xp, (0, 2, 4, 3, 5, 1))                       # (B, h, w, p1, p2, C)
    xp = xp.reshape(B, N, Dp)
    xp = jnp.pad(xp, ((0, 0), (1, 0), (0, 0))).astype(jnp.bfloat16)  # (B, S, Dp)

    # pos row 0 (CLS slot) zero-padded; it is overwritten in-kernel anyway.
    pos = jnp.pad(params["pos"].astype(jnp.float32), ((1, 0), (0, 0)))  # (S, Hd)
    w_bf16 = params["w"].astype(jnp.bfloat16)
    cls = params["cls"].reshape(1, Hd).astype(jnp.float32)

    vmem_limit = _vmem_limit_bytes()
    TILE, nt, BB = _choose_blocks(B, S, Dp, Hd, vmem_limit)
    nb = B // BB

    # NOTE: for production shapes Hd should be a multiple of 128 for lane-dense
    # output stores; the toy Hd=32 uses the full-dim block (legal, just narrow).
    const = _resident_spec
    out = pl.pallas_call(
        _patch_embed_kernel,
        out_shape=jax.ShapeDtypeStruct((B, S, Hd), jnp.float32),
        grid_spec=pltpu.PrefetchScalarGridSpec(
            num_scalar_prefetch=0,
            # Row-tile axis OUTER so the pos block stays resident across the
            # entire batch sweep (not re-DMA'd once per batch block).
            grid=(nt, nb),
            in_specs=[
                pl.BlockSpec((BB, TILE, Dp), lambda i, b: (b, i, 0)),   # x rows (bf16)
                const((1, Dp),   lambda i, b: (0, 0)),                  # ln1 gamma
                const((1, Dp),   lambda i, b: (0, 0)),                  # ln1 beta
                const((Dp, Hd),  lambda i, b: (0, 0)),                  # weight (bf16)
                const((1, Hd),   lambda i, b: (0, 0)),                  # linear bias
                const((1, Hd),   lambda i, b: (0, 0)),                  # ln2 gamma
                const((1, Hd),   lambda i, b: (0, 0)),                  # ln2 beta
                pl.BlockSpec((TILE, Hd), lambda i, b: (i, 0)),          # pos (padded)
                const((1, Hd),   lambda i, b: (0, 0)),                  # cls token
            ],
            out_specs=pl.BlockSpec((BB, TILE, Hd), lambda i, b: (b, i, 0)),
        ),
        compiler_params=pltpu.CompilerParams(
            dimension_semantics=("parallel", "parallel"),
            vmem_limit_bytes=vmem_limit,
        ),
    )(xp, params["ln1_g"], params["ln1_b"], w_bf16, params["b"],
      params["ln2_g"], params["ln2_b"], pos, cls)

    # TODO(synk): nn.Dropout(0.1) is identity in eval mode; training-mode dropout not applied.
    return out


def init_params(key, *, num_channels, patch_size, hidden_size, num_patches):
    patch_dim = num_channels * patch_size * patch_size
    k_w, k_b, k_pos, k_cls = jax.random.split(key, 4)
    return {
        # LayerNorm defaults: gamma=1, beta=0 (as torch nn.LayerNorm init)
        "ln1_g": jnp.ones((1, patch_dim), jnp.float32),
        "ln1_b": jnp.zeros((1, patch_dim), jnp.float32),
        # Linear(patch_dim, hidden): stored as (patch_dim, hidden) = W.T of torch
        "w": (jax.random.normal(k_w, (patch_dim, hidden_size), jnp.float32)
              * (1.0 / jnp.sqrt(patch_dim))),
        "b": jax.random.normal(k_b, (1, hidden_size), jnp.float32) * 0.01,
        "ln2_g": jnp.ones((1, hidden_size), jnp.float32),
        "ln2_b": jnp.zeros((1, hidden_size), jnp.float32),
        # pos_embedding (1, N, H) -> stored (N, H); cls_token (1, 1, H)
        "pos": jax.random.normal(k_pos, (num_patches, hidden_size), jnp.float32),
        "cls": jax.random.normal(k_cls, (1, 1, hidden_size), jnp.float32),
    }


def _reference(pixel_values, params, *, patch_size,
               io_dtype=jnp.float32, matmul_dtype=jnp.float32):
    """Pure-JAX reference of the PyTorch forward (I/O and matmul dtypes selectable)."""
    B, C, Himg, Wimg = pixel_values.shape
    p = patch_size
    h, w = Himg // p, Wimg // p
    xp = pixel_values.reshape(B, C, h, p, w, p)
    xp = jnp.transpose(xp, (0, 2, 4, 3, 5, 1)).reshape(B, h * w, C * p * p)
    xp = xp.astype(io_dtype).astype(jnp.float32)

    def ln(x, g, b):
        mu = jnp.mean(x, axis=-1, keepdims=True)
        var = jnp.mean((x - mu) ** 2, axis=-1, keepdims=True)
        return (x - mu) / jnp.sqrt(var + LN_EPS) * g + b

    x = ln(xp, params["ln1_g"][0], params["ln1_b"][0])
    x = jnp.dot(x.astype(matmul_dtype), params["w"].astype(matmul_dtype),
                preferred_element_type=jnp.float32) + params["b"][0]
    x = ln(x, params["ln2_g"][0], params["ln2_b"][0])
    x = x + params["pos"][None]
    cls = jnp.broadcast_to(params["cls"].reshape(1, 1, -1), (B, 1, x.shape[-1]))
    return jnp.concatenate([cls, x], axis=1)


if __name__ == "__main__":
    # Small config: image_size=16, patch_size=4, num_channels=4, hidden_size=32
    B, C, IMG, P, HID = 2, 4, 16, 4, 32
    N = (IMG // P) ** 2

    key = jax.random.PRNGKey(0)
    k_x, k_p = jax.random.split(key)
    pixel_values = jax.random.normal(k_x, (B, C, IMG, IMG), jnp.float32)
    params = init_params(k_p, num_channels=C, patch_size=P,
                         hidden_size=HID, num_patches=N)

    fwd = jax.jit(lambda pv, pr: patch_embedding_forward(pv, pr, patch_size=P))
    out = fwd(pixel_values, params)
    out = jax.block_until_ready(out)

    assert out.shape == (B, N + 1, HID), out.shape

    # Reference mirroring the kernel's numerics (bf16 input, bf16 MXU, f32 acc).
    ref_bf16 = _reference(pixel_values, params, patch_size=P,
                          io_dtype=jnp.bfloat16, matmul_dtype=jnp.bfloat16)
    # Full-f32 reference (exact PyTorch semantics) with looser tolerance for the
    # intentional bf16 input/matmul rounding.
    ref_f32 = _reference(pixel_values, params, patch_size=P,
                         io_dtype=jnp.float32, matmul_dtype=jnp.float32)

    assert jnp.allclose(out, ref_bf16, atol=5e-3, rtol=5e-3), \
        float(jnp.max(jnp.abs(out - ref_bf16)))
    assert jnp.allclose(out, ref_f32, atol=5e-2, rtol=5e-2), \
        float(jnp.max(jnp.abs(out - ref_f32)))

    print("KERNEL_OK")
</pallas_src>

<mosaic_0001>
module attributes {stable_mosaic.version = 11 : i64} {
  func.func @_patch_embed_kernel(%arg0: i32, %arg1: i32, %arg2: memref<2x17x64xbf16, #tpu.memory_space<vmem>>, %arg3: memref<1x64xf32, #tpu.memory_space<vmem>>, %arg4: memref<1x64xf32, #tpu.memory_space<vmem>>, %arg5: memref<64x32xbf16, #tpu.memory_space<vmem>>, %arg6: memref<1x32xf32, #tpu.memory_space<vmem>>, %arg7: memref<1x32xf32, #tpu.memory_space<vmem>>, %arg8: memref<1x32xf32, #tpu.memory_space<vmem>>, %arg9: memref<17x32xf32, #tpu.memory_space<vmem>>, %arg10: memref<1x32xf32, #tpu.memory_space<vmem>>, %arg11: memref<2x17x32xf32, #tpu.memory_space<vmem>>) attributes {dimension_semantics = [#tpu.dimension_semantics<parallel>, #tpu.dimension_semantics<parallel>], iteration_bounds = array<i64: 1, 1>, scalar_prefetch = 0 : i64, scratch_operands = 0 : i64, tpu.core_type = #tpu.core_type<tc>, window_params = [{transform_indices = @transform_0, window_bounds = array<i64: 2, 17, 64>}, {pipeline_mode = #tpu.pipeline_mode<synchronous>, transform_indices = @transform_1, window_bounds = array<i64: 1, 64>}, {pipeline_mode = #tpu.pipeline_mode<synchronous>, transform_indices = @transform_2, window_bounds = array<i64: 1, 64>}, {pipeline_mode = #tpu.pipeline_mode<synchronous>, transform_indices = @transform_3, window_bounds = array<i64: 64, 32>}, {pipeline_mode = #tpu.pipeline_mode<synchronous>, transform_indices = @transform_4, window_bounds = array<i64: 1, 32>}, {pipeline_mode = #tpu.pipeline_mode<synchronous>, transform_indices = @transform_5, window_bounds = array<i64: 1, 32>}, {pipeline_mode = #tpu.pipeline_mode<synchronous>, transform_indices = @transform_6, window_bounds = array<i64: 1, 32>}, {transform_indices = @transform_7, window_bounds = array<i64: 17, 32>}, {pipeline_mode = #tpu.pipeline_mode<synchronous>, transform_indices = @transform_8, window_bounds = array<i64: 1, 32>}, {transform_indices = @transform_9, window_bounds = array<i64: 2, 17, 32>}]} {
    %c0 = arith.constant 0 : index
    %c0_0 = arith.constant 0 : index
    %0 = vector.load %arg9[%c0, %c0_0] : memref<17x32xf32, #tpu.memory_space<vmem>>, vector<17x32xf32>
    %c0_1 = arith.constant 0 : index
    %c0_2 = arith.constant 0 : index
    %1 = vector.load %arg3[%c0_1, %c0_2] : memref<1x64xf32, #tpu.memory_space<vmem>>, vector<1x64xf32>
    %c0_3 = arith.constant 0 : index
    %c0_4 = arith.constant 0 : index
    %2 = vector.load %arg4[%c0_3, %c0_4] : memref<1x64xf32, #tpu.memory_space<vmem>>, vector<1x64xf32>
    %c0_5 = arith.constant 0 : index
    %c0_6 = arith.constant 0 : index
    %3 = vector.load %arg7[%c0_5, %c0_6] : memref<1x32xf32, #tpu.memory_space<vmem>>, vector<1x32xf32>
    %c0_7 = arith.constant 0 : index
    %c0_8 = arith.constant 0 : index
    %4 = vector.load %arg8[%c0_7, %c0_8] : memref<1x32xf32, #tpu.memory_space<vmem>>, vector<1x32xf32>
    %c0_9 = arith.constant 0 : index
    %c0_10 = arith.constant 0 : index
    %5 = vector.load %arg6[%c0_9, %c0_10] : memref<1x32xf32, #tpu.memory_space<vmem>>, vector<1x32xf32>
    %c0_11 = arith.constant 0 : index
    %c0_12 = arith.constant 0 : index
    %6 = vector.load %arg5[%c0_11, %c0_12] : memref<64x32xbf16, #tpu.memory_space<vmem>>, vector<64x32xbf16>
    %c0_13 = arith.constant 0 : index
    %c0_14 = arith.constant 0 : index
    %c0_15 = arith.constant 0 : index
    %7 = vector.load %arg2[%c0_13, %c0_14, %c0_15] : memref<2x17x64xbf16, #tpu.memory_space<vmem>>, vector<1x17x64xbf16>
    %8 = vector.shape_cast %7 : vector<1x17x64xbf16> to vector<17x64xbf16>
    %9 = arith.extf %8 : vector<17x64xbf16> to vector<17x64xf32>
    %cst = arith.constant dense<0.000000e+00> : vector<17xf32>
    %10 = vector.multi_reduction <add>, %9, %cst [1] : vector<17x64xf32> to vector<17xf32>
    %11 = vector.shape_cast %10 : vector<17xf32> to vector<17x1xf32>
    %cst_16 = arith.constant 6.400000e+01 : f32
    %12 = vector.broadcast %cst_16 : f32 to vector<17x1xf32>
    %13 = arith.divf %11, %12 : vector<17x1xf32>
    %14 = vector.broadcast %13 : vector<17x1xf32> to vector<17x64xf32>
    %15 = arith.subf %9, %14 : vector<17x64xf32>
    %16 = arith.mulf %15, %15 : vector<17x64xf32>
    %cst_17 = arith.constant dense<0.000000e+00> : vector<17xf32>
    %17 = vector.multi_reduction <add>, %16, %cst_17 [1] : vector<17x64xf32> to vector<17xf32>
    %18 = vector.shape_cast %17 : vector<17xf32> to vector<17x1xf32>
    %cst_18 = arith.constant 6.400000e+01 : f32
    %19 = vector.broadcast %cst_18 : f32 to vector<17x1xf32>
    %20 = arith.divf %18, %19 : vector<17x1xf32>
    %cst_19 = arith.constant 9.99999974E-6 : f32
    %21 = vector.broadcast %cst_19 : f32 to vector<17x1xf32>
    %22 = arith.addf %20, %21 : vector<17x1xf32>
    %23 = math.rsqrt %22 : vector<17x1xf32>
    %24 = vector.broadcast %23 : vector<17x1xf32> to vector<17x64xf32>
    %25 = arith.mulf %15, %24 : vector<17x64xf32>
    %26 = vector.broadcast %1 : vector<1x64xf32> to vector<17x64xf32>
    %27 = arith.mulf %25, %26 : vector<17x64xf32>
    %28 = vector.broadcast %2 : vector<1x64xf32> to vector<17x64xf32>
    %29 = arith.addf %27, %28 : vector<17x64xf32>
    %30 = arith.truncf %29 : vector<17x64xf32> to vector<17x64xbf16>
    %cst_20 = arith.constant dense<0.000000e+00> : vector<17x32xf32>
    %31 = tpu.matmul %30, %6, %cst_20 {dimension_numbers = #tpu.dot_dimension_numbers<[1], [0], [0], [1], [0, 0, 1, 1], [], []>} : vector<17x64xbf16>, vector<64x32xbf16>, vector<17x32xf32> -> vector<17x32xf32>
    %32 = vector.broadcast %5 : vector<1x32xf32> to vector<17x32xf32>
    %33 = arith.addf %31, %32 : vector<17x32xf32>
    %cst_21 = arith.constant dense<0.000000e+00> : vector<17xf32>
    %34 = vector.multi_reduction <add>, %33, %cst_21 [1] : vector<17x32xf32> to vector<17xf32>
    %35 = vector.shape_cast %34 : vector<17xf32> to vector<17x1xf32>
    %cst_22 = arith.constant 3.200000e+01 : f32
    %36 = vector.broadcast %cst_22 : f32 to vector<17x1xf32>
    %37 = arith.divf %35, %36 : vector<17x1xf32>
    %38 = vector.broadcast %37 : vector<17x1xf32> to vector<17x32xf32>
    %39 = arith.subf %33, %38 : vector<17x32xf32>
    %40 = arith.mulf %39, %39 : vector<17x32xf32>
    %cst_23 = arith.constant dense<0.000000e+00> : vector<17xf32>
    %41 = vector.multi_reduction <add>, %40, %cst_23 [1] : vector<17x32xf32> to vector<17xf32>
    %42 = vector.shape_cast %41 : vector<17xf32> to vector<17x1xf32>
    %cst_24 = arith.constant 3.200000e+01 : f32
    %43 = vector.broadcast %cst_24 : f32 to vector<17x1xf32>
    %44 = arith.divf %42, %43 : vector<17x1xf32>
    %cst_25 = arith.constant 9.99999974E-6 : f32
    %45 = vector.broadcast %cst_25 : f32 to vector<17x1xf32>
    %46 = arith.addf %44, %45 : vector<17x1xf32>
    %47 = math.rsqrt %46 : vector<17x1xf32>
    %48 = vector.broadcast %47 : vector<17x1xf32> to vector<17x32xf32>
    %49 = arith.mulf %39, %48 : vector<17x32xf32>
    %50 = vector.broadcast %3 : vector<1x32xf32> to vector<17x32xf32>
    %51 = arith.mulf %49, %50 : vector<17x32xf32>
    %52 = vector.broadcast %4 : vector<1x32xf32> to vector<17x32xf32>
    %53 = arith.addf %51, %52 : vector<17x32xf32>
    %54 = arith.addf %53, %0 : vector<17x32xf32>
    %c0_26 = arith.constant 0 : index
    %c0_27 = arith.constant 0 : index
    %c0_28 = arith.constant 0 : index
    %55 = vector.load %arg11[%c0_26, %c0_27, %c0_28] : memref<2x17x32xf32, #tpu.memory_space<vmem>>, vector<1x17x32xf32>
    %56 = vector.shape_cast %55 : vector<1x17x32xf32> to vector<17x32xf32>
    %57 = vector.shape_cast %54 : vector<17x32xf32> to vector<1x17x32xf32>
    tpu.vector_store %arg11[%c0_26, %c0_27, %c0_28], %57 {strides = array<i32>} : memref<2x17x32xf32, #tpu.memory_space<vmem>>, vector<1x17x32xf32>,
    %c1 = arith.constant 1 : index
    %c0_29 = arith.constant 0 : index
    %c0_30 = arith.constant 0 : index
    %58 = vector.load %arg2[%c1, %c0_29, %c0_30] : memref<2x17x64xbf16, #tpu.memory_space<vmem>>, vector<1x17x64xbf16>
    %59 = vector.shape_cast %58 : vector<1x17x64xbf16> to vector<17x64xbf16>
    %60 = arith.extf %59 : vector<17x64xbf16> to vector<17x64xf32>
    %cst_31 = arith.constant dense<0.000000e+00> : vector<17xf32>
    %61 = vector.multi_reduction <add>, %60, %cst_31 [1] : vector<17x64xf32> to vector<17xf32>
    %62 = vector.shape_cast %61 : vector<17xf32> to vector<17x1xf32>
    %cst_32 = arith.constant 6.400000e+01 : f32
    %63 = vector.broadcast %cst_32 : f32 to vector<17x1xf32>
    %64 = arith.divf %62, %63 : vector<17x1xf32>
    %65 = vector.broadcast %64 : vector<17x1xf32> to vector<17x64xf32>
    %66 = arith.subf %60, %65 : vector<17x64xf32>
    %67 = arith.mulf %66, %66 : vector<17x64xf32>
    %cst_33 = arith.constant dense<0.000000e+00> : vector<17xf32>
    %68 = vector.multi_reduction <add>, %67, %cst_33 [1] : vector<17x64xf32> to vector<17xf32>
    %69 = vector.shape_cast %68 : vector<17xf32> to vector<17x1xf32>
    %cst_34 = arith.constant 6.400000e+01 : f32
    %70 = vector.broadcast %cst_34 : f32 to vector<17x1xf32>
    %71 = arith.divf %69, %70 : vector<17x1xf32>
    %cst_35 = arith.constant 9.99999974E-6 : f32
    %72 = vector.broadcast %cst_35 : f32 to vector<17x1xf32>
    %73 = arith.addf %71, %72 : vector<17x1xf32>
    %74 = math.rsqrt %73 : vector<17x1xf32>
    %75 = vector.broadcast %74 : vector<17x1xf32> to vector<17x64xf32>
    %76 = arith.mulf %66, %75 : vector<17x64xf32>
    %77 = vector.broadcast %1 : vector<1x64xf32> to vector<17x64xf32>
    %78 = arith.mulf %76, %77 : vector<17x64xf32>
    %79 = vector.broadcast %2 : vector<1x64xf32> to vector<17x64xf32>
    %80 = arith.addf %78, %79 : vector<17x64xf32>
    %81 = arith.truncf %80 : vector<17x64xf32> to vector<17x64xbf16>
    %cst_36 = arith.constant dense<0.000000e+00> : vector<17x32xf32>
    %82 = tpu.matmul %81, %6, %cst_36 {dimension_numbers = #tpu.dot_dimension_numbers<[1], [0], [0], [1], [0, 0, 1, 1], [], []>} : vector<17x64xbf16>, vector<64x32xbf16>, vector<17x32xf32> -> vector<17x32xf32>
    %83 = vector.broadcast %5 : vector<1x32xf32> to vector<17x32xf32>
    %84 = arith.addf %82, %83 : vector<17x32xf32>
    %cst_37 = arith.constant dense<0.000000e+00> : vector<17xf32>
    %85 = vector.multi_reduction <add>, %84, %cst_37 [1] : vector<17x32xf32> to vector<17xf32>
    %86 = vector.shape_cast %85 : vector<17xf32> to vector<17x1xf32>
    %cst_38 = arith.constant 3.200000e+01 : f32
    %87 = vector.broadcast %cst_38 : f32 to vector<17x1xf32>
    %88 = arith.divf %86, %87 : vector<17x1xf32>
    %89 = vector.broadcast %88 : vector<17x1xf32> to vector<17x32xf32>
    %90 = arith.subf %84, %89 : vector<17x32xf32>
    %91 = arith.mulf %90, %90 : vector<17x32xf32>
    %cst_39 = arith.constant dense<0.000000e+00> : vector<17xf32>
    %92 = vector.multi_reduction <add>, %91, %cst_39 [1] : vector<17x32xf32> to vector<17xf32>
    %93 = vector.shape_cast %92 : vector<17xf32> to vector<17x1xf32>
    %cst_40 = arith.constant 3.200000e+01 : f32
    %94 = vector.broadcast %cst_40 : f32 to vector<17x1xf32>
    %95 = arith.divf %93, %94 : vector<17x1xf32>
    %cst_41 = arith.constant 9.99999974E-6 : f32
    %96 = vector.broadcast %cst_41 : f32 to vector<17x1xf32>
    %97 = arith.addf %95, %96 : vector<17x1xf32>
    %98 = math.rsqrt %97 : vector<17x1xf32>
    %99 = vector.broadcast %98 : vector<17x1xf32> to vector<17x32xf32>
    %100 = arith.mulf %90, %99 : vector<17x32xf32>
    %101 = vector.broadcast %3 : vector<1x32xf32> to vector<17x32xf32>
    %102 = arith.mulf %100, %101 : vector<17x32xf32>
    %103 = vector.broadcast %4 : vector<1x32xf32> to vector<17x32xf32>
    %104 = arith.addf %102, %103 : vector<17x32xf32>
    %105 = arith.addf %104, %0 : vector<17x32xf32>
    %c1_42 = arith.constant 1 : index
    %c0_43 = arith.constant 0 : index
    %c0_44 = arith.constant 0 : index
    %106 = vector.load %arg11[%c1_42, %c0_43, %c0_44] : memref<2x17x32xf32, #tpu.memory_space<vmem>>, vector<1x17x32xf32>
    %107 = vector.shape_cast %106 : vector<1x17x32xf32> to vector<17x32xf32>
    %108 = vector.shape_cast %105 : vector<17x32xf32> to vector<1x17x32xf32>
    tpu.vector_store %arg11[%c1_42, %c0_43, %c0_44], %108 {strides = array<i32>} : memref<2x17x32xf32, #tpu.memory_space<vmem>>, vector<1x17x32xf32>,
    %c0_i32 = arith.constant 0 : i32
    %109 = arith.cmpi eq, %arg0, %c0_i32 : i32
    %110 = arith.extui %109 : i1 to i32
    %c0_i32_45 = arith.constant 0 : i32
    %111 = arith.cmpi ne, %110, %c0_i32_45 : i32
    scf.if %111 {
      %c0_46 = arith.constant 0 : index
      %c0_47 = arith.constant 0 : index
      %112 = vector.load %arg10[%c0_46, %c0_47] : memref<1x32xf32, #tpu.memory_space<vmem>>, vector<1x32xf32>
      %c0_48 = arith.constant 0 : index
      %c0_49 = arith.constant 0 : index
      %c0_50 = arith.constant 0 : index
      %113 = vector.load %arg11[%c0_48, %c0_49, %c0_50] : memref<2x17x32xf32, #tpu.memory_space<vmem>>, vector<1x1x32xf32>
      %114 = vector.shape_cast %113 : vector<1x1x32xf32> to vector<1x32xf32>
      %115 = vector.shape_cast %112 : vector<1x32xf32> to vector<1x1x32xf32>
      tpu.vector_store %arg11[%c0_48, %c0_49, %c0_50], %115 {strides = array<i32>} : memref<2x17x32xf32, #tpu.memory_space<vmem>>, vector<1x1x32xf32>,
      %c1_51 = arith.constant 1 : index
      %c0_52 = arith.constant 0 : index
      %c0_53 = arith.constant 0 : index
      %116 = vector.load %arg11[%c1_51, %c0_52, %c0_53] : memref<2x17x32xf32, #tpu.memory_space<vmem>>, vector<1x1x32xf32>
      %117 = vector.shape_cast %116 : vector<1x1x32xf32> to vector<1x32xf32>
      %118 = vector.shape_cast %112 : vector<1x32xf32> to vector<1x1x32xf32>
      tpu.vector_store %arg11[%c1_51, %c0_52, %c0_53], %118 {strides = array<i32>} : memref<2x17x32xf32, #tpu.memory_space<vmem>>, vector<1x1x32xf32>,
    } else {
    }
    return
  }
  func.func @transform_0(%arg0: i32, %arg1: i32) -> (i32, i32, i32) {
    %c0_i32 = arith.constant 0 : i32
    %c0_i32_0 = arith.constant 0 : i32
    return %arg1, %arg0, %c0_i32 : i32, i32, i32
  }
  func.func @transform_1(%arg0: i32, %arg1: i32) -> (i32, i32) {
    %c0_i32 = arith.constant 0 : i32
    %c0_i32_0 = arith.constant 0 : i32
    %c0_i32_1 = arith.constant 0 : i32
    return %c0_i32, %c0_i32_0 : i32, i32
  }
  func.func @transform_2(%arg0: i32, %arg1: i32) -> (i32, i32) {
    %c0_i32 = arith.constant 0 : i32
    %c0_i32_0 = arith.constant 0 : i32
    %c0_i32_1 = arith.constant 0 : i32
    return %c0_i32, %c0_i32_0 : i32, i32
  }
  func.func @transform_3(%arg0: i32, %arg1: i32) -> (i32, i32) {
    %c0_i32 = arith.constant 0 : i32
    %c0_i32_0 = arith.constant 0 : i32
    %c0_i32_1 = arith.constant 0 : i32
    return %c0_i32, %c0_i32_0 : i32, i32
  }
  func.func @transform_4(%arg0: i32, %arg1: i32) -> (i32, i32) {
    %c0_i32 = arith.constant 0 : i32
    %c0_i32_0 = arith.constant 0 : i32
    %c0_i32_1 = arith.constant 0 : i32
    return %c0_i32, %c0_i32_0 : i32, i32
  }
  func.func @transform_5(%arg0: i32, %arg1: i32) -> (i32, i32) {
    %c0_i32 = arith.constant 0 : i32
    %c0_i32_0 = arith.constant 0 : i32
    %c0_i32_1 = arith.constant 0 : i32
    return %c0_i32, %c0_i32_0 : i32, i32
  }
  func.func @transform_6(%arg0: i32, %arg1: i32) -> (i32, i32) {
    %c0_i32 = arith.constant 0 : i32
    %c0_i32_0 = arith.constant 0 : i32
    %c0_i32_1 = arith.constant 0 : i32
    return %c0_i32, %c0_i32_0 : i32, i32
  }
  func.func @transform_7(%arg0: i32, %arg1: i32) -> (i32, i32) {
    %c0_i32 = arith.constant 0 : i32
    %c0_i32_0 = arith.constant 0 : i32
    return %arg0, %c0_i32 : i32, i32
  }
  func.func @transform_8(%arg0: i32, %arg1: i32) -> (i32, i32) {
    %c0_i32 = arith.constant 0 : i32
    %c0_i32_0 = arith.constant 0 : i32
    %c0_i32_1 = arith.constant 0 : i32
    return %c0_i32, %c0_i32_0 : i32, i32
  }
  func.func @transform_9(%arg0: i32, %arg1: i32) -> (i32, i32, i32) {
    %c0_i32 = arith.constant 0 : i32
    %c0_i32_0 = arith.constant 0 : i32
    return %arg1, %arg0, %c0_i32 : i32, i32, i32
  }
}

</mosaic_0001>

<bundles_post_ra>
// kernel: _lambda_.1
= control target key start
LH: loop header
LB: loop body
LE: loop exit
PB: predicated region body
PF: predicated region fallthrough
CT: control target
= control target key end

     0   :  { %vm55_vm0 = vcmask 523264   ;;  %vm62_vm1 = vcmask 516096   ;;  %v561_v16 = vmov 64.0   ;;  %s857_s0 = inlined_call_operand.vmem [shape: bf16[2,17,64], index: 0, kind: input, shape index: {}]   ;;  %s858_s1 = inlined_call_operand.vmem [shape: f32[1,64], index: 1, kind: input, shape index: {}]   ;;  %s859_s2 = inlined_call_operand.vmem [shape: f32[1,64], index: 2, kind: input, shape index: {}]   ;;  %s860_s4 = inlined_call_operand.vmem [shape: f32[1,32], index: 4, kind: input, shape index: {}]   ;;  %s861_s3 = inlined_call_operand.vmem [shape: bf16[64,32], index: 3, kind: input, shape index: {}]   ;;  %s862_s5 = inlined_call_operand.vmem [shape: f32[1,32], index: 5, kind: input, shape index: {}]   ;;  %s863_s6 = inlined_call_operand.vmem [shape: f32[1,32], index: 6, kind: input, shape index: {}]   ;;  %s864_s7 = inlined_call_operand.vmem [shape: f32[17,32], index: 7, kind: input, shape index: {}]   ;;  %s865_s8 = inlined_call_operand.vmem [shape: f32[1,32], index: 8, kind: input, shape index: {}]   ;;  %s866_s9 = inlined_call_operand.vmem [shape: f32[2,17,32], index: 9, kind: output, shape index: {}]  }
   0x1   :  { %v501_v0 = vld [vmem:[%s857_s0 + $0xc] sm:$0xff]   ;;  %v51_v1 = vld [vmem:[%s857_s0 + $0x8] sm:$0x1]  ;;  %v515_v2 = vld [vmem:[%s857_s0] sm:$0xff]   ;;  %533 = vrcp.f32 %v561_v16 }
   0x2   :  { %v292_v3 = vunpack.c.l.bf16 %v501_v0  ;;  %v54_v4 = vunpack.c.l.bf16 %v51_v1  ;;  %v516_v5 = vunpack.c.l.bf16 %v515_v2  ;;  %v503_v6 = vld [vmem:[%s857_s0 + $0x14] sm:$0x1]  ;;  %v293_v10 = vunpack.c.h.bf16 %v501_v0  ;;  %v513_v53 = vld [vmem:[%s861_s3 + $0x18] sm:$0xff]  ;;  %v511_v58 = vld [vmem:[%s861_s3 + $0x8] sm:$0xff] }
   0x3   :  { %v294_v11 = vunpack.c.l.bf16 %v503_v6  ;;  %v517_v12 = vunpack.c.h.bf16 %v515_v2  ;;  %181 = vmatpush.bf16.msra.mxu0 %v513_v53  ;;  %379 = vmatpush.bf16.msra.mxu1 %v513_v53  ;;  %v512_v54 = vld [vmem:[%s861_s3 + $0x10] sm:$0xff]  ;;  %v510_v62 = vld [vmem:[%s861_s3] sm:$0xff] }
   0x4   :  { %v295_v7 = vsel %vm55_vm0, %v292_v3, 0.0  ;;  %v63_v8 = vsel %vm62_vm1, %v54_v4, 0.0  ;;  %v56_v9 = vsel %vm55_vm0, %v516_v5, 0.0  ;;  %v298_v13 = vsel %vm55_vm0, %v293_v10, 0.0  ;;  %522 = vmatpush.bf16.msra.mxu3 %v513_v53  ;;  %518 = vmatpush.bf16.msra.mxu2 %v513_v53 }
   0x5   :  { %296 = vadd.xlane.f32.xlu1 %v295_v7  ;;  %64 = vadd.xlane.f32.xlu2 %v63_v8  ;;  %v301_v14 = vsel %vm62_vm1, %v294_v11, 0.0  ;;  %v59_v15 = vsel %vm55_vm0, %v517_v12, 0.0 }
   0x6   :  { %57 = vadd.xlane.f32.xlu0 %v56_v9 }
   0x7   :  { %v534_v17 = vpop.eup %533  ;;  %182 = vmatpush.bf16.msra.mxu0 %v512_v54  ;;  %380 = vmatpush.bf16.msra.mxu1 %v512_v54 }
   0x8   :  { %v67_v18 = vmul.f32 64.0, %v534_v17  ;;  %vm71_vm2 = vweird.f32 %v534_v17  ;;  %523 = vmatpush.bf16.msra.mxu3 %v512_v54  ;;  %519 = vmatpush.bf16.msra.mxu2 %v512_v54 }
   0xa   :  { %v68_v19 = vsub.f32 1.0, %v67_v18 }
   0xb   :  { %183 = vmatpush.bf16.msra.mxu0 %v511_v58  ;;  %381 = vmatpush.bf16.msra.mxu1 %v511_v58 }
   0xc   :  { %v69_v20 = vmul.f32 %v534_v17, %v68_v19  ;;  %524 = vmatpush.bf16.msra.mxu3 %v511_v58  ;;  %520 = vmatpush.bf16.msra.mxu2 %v511_v58 }
   0xd   :  { %299 = vadd.xlane.f32.xlu1 %v298_v13  ;;  %302 = vadd.xlane.f32.xlu2 %v301_v14 }
   0xe   :  { %60 = vadd.xlane.f32.xlu0 %v59_v15  ;;  %v70_v21 = vadd.f32 %v534_v17, %v69_v20 }
   0xf   :  { %184 = vmatpush.bf16.msra.mxu0 %v510_v62  ;;  %382 = vmatpush.bf16.msra.mxu1 %v510_v62 }
  0x10   :  { %v631_v22 = vsel %vm71_vm2, %v534_v17, %v70_v21  ;;  %525 = vmatpush.bf16.msra.mxu3 %v510_v62  ;;  %521 = vmatpush.bf16.msra.mxu2 %v510_v62 }
  0x78   :  { %v297_v23 = vpop.xlane.xlu1 %296  ;;  %v65_v24 = vpop.xlane.xlu2 %64 }
  0x79   :  { %v304_v25 = vmul.f32 %v297_v23, %v631_v22  ;;  %v58_v26 = vpop.xlane.xlu0 %57  ;;  %v75_v42 = vmul.f32 %v631_v22, %v65_v24 }
  0x7a   :  { %v73_v27 = vmul.f32 %v631_v22, %v58_v26 }
  0x7b   :  { %v635_v28 = vsub.f32 %v292_v3, %v304_v25  ;;  %v663_v49 = vsub.f32 %v54_v4, %v75_v42 }
  0x7c   :  { %v637_v29 = vsub.f32 %v516_v5, %v73_v27 }
  0x7d   :  { %v310_v30 = vmul.f32 %v635_v28, %v635_v28  ;;  %v81_v51 = vmul.f32 %v663_v49, %v663_v49 }
  0x7e   :  { %v79_v31 = vmul.f32 %v637_v29, %v637_v29 }
  0x7f   :  { %v313_v32 = vsel %vm55_vm0, %v310_v30, 0.0  ;;  %v88_v52 = vsel %vm62_vm1, %v81_v51, 0.0 }
  0x80   :  { %v300_v33 = vpop.xlane.xlu1 %299  ;;  %314 = vadd.xlane.f32.xlu2 %v313_v32  ;;  %v303_v34 = vpop.xlane.xlu2 %302  ;;  %v82_v35 = vsel %vm55_vm0, %v79_v31, 0.0 }
  0x81   :  { %v305_v36 = vmul.f32 %v300_v33, %v631_v22  ;;  %v306_v37 = vmul.f32 %v303_v34, %v631_v22  ;;  %83 = vadd.xlane.f32.xlu0 %v82_v35  ;;  %v61_v38 = vpop.xlane.xlu0 %60 }
  0x82   :  { %v74_v39 = vmul.f32 %v631_v22, %v61_v38 }
  0x83   :  { %v648_v40 = vsub.f32 %v293_v10, %v305_v36  ;;  %v650_v41 = vsub.f32 %v294_v11, %v306_v37 }
  0x84   :  { %v653_v43 = vsub.f32 %v517_v12, %v74_v39 }
  0x85   :  { %v312_v44 = vmul.f32 %v650_v41, %v650_v41  ;;  %v311_v45 = vmul.f32 %v648_v40, %v648_v40 }
  0x86   :  { %v80_v46 = vmul.f32 %v653_v43, %v653_v43 }
  0x87   :  { %v319_v47 = vsel %vm62_vm1, %v312_v44, 0.0  ;;  %v316_v48 = vsel %vm55_vm0, %v311_v45, 0.0 }
  0x88   :  { %320 = vadd.xlane.f32.xlu2 %v319_v47  ;;  %v85_v50 = vsel %vm55_vm0, %v80_v46, 0.0 }
  0x89   :  { %317 = vadd.xlane.f32.xlu0 %v316_v48  ;;  %86 = vadd.xlane.f32.xlu1 %v85_v50  ;;  %v528_v48 = vld [vmem:[%s858_s1] ss:$0 sm:$0xff] }
  0x91   :  { %89 = vadd.xlane.f32.xlu1 %v88_v52 }
  0xf3   :  { %v315_v55 = vpop.xlane.xlu2 %314 }
  0xf4   :  { %v322_v56 = vmul.f32 %v315_v55, %v631_v22  ;;  %v84_v57 = vpop.xlane.xlu0 %83 }
  0xf5   :  { %v91_v59 = vmul.f32 %v84_v57, %v631_v22 }
  0xf6   :  { %v325_v60 = vadd.f32 1e-05, %v322_v56 }
  0xf7   :  { %v94_v61 = vadd.f32 1e-05, %v91_v59 }
  0xf8   :  { %535 = vrsqrt.f32 %v325_v60  ;;  %vm334_vm3 = vweird.f32 %v325_v60 }
  0xf9   :  { %537 = vrsqrt.f32 %v94_v61  ;;  %vm103_vm6 = vweird.f32 %v94_v61 }
  0xfb   :  { %v321_v63 = vpop.xlane.xlu2 %320 }
  0xfc   :  { %v324_v0 = vmul.f32 %v321_v63, %v631_v22  ;;  %v87_v1 = vpop.xlane.xlu1 %86  ;;  %v318_v2 = vpop.xlane.xlu0 %317 }
  0xfd   :  { %v92_v3 = vmul.f32 %v87_v1, %v631_v22  ;;  %v323_v4 = vmul.f32 %v318_v2, %v631_v22 }
  0xfe   :  { %v536_v5 = vpop.eup %535  ;;  %v327_v6 = vadd.f32 1e-05, %v324_v0 }
  0xff   :  { %v538_v7 = vpop.eup %537  ;;  %v329_v8 = vmul.f32 %v536_v5, %v325_v60  ;;  %v95_v9 = vadd.f32 1e-05, %v92_v3  ;;  %v326_v10 = vadd.f32 1e-05, %v323_v4  ;;  %vm335_vm5 = vweird.f32 %v536_v5 }
 0x100   :  { %v98_v11 = vmul.f32 %v538_v7, %v94_v61  ;;  %539 = vrsqrt.f32 %v327_v6  ;;  %vm104_vm4 = vweird.f32 %v538_v7  ;;  %vm690_vm8 = vmor %vm334_vm3, %vm335_vm5  ;;  %vm354_vm9 = vweird.f32 %v327_v6 }
 0x101   :  { %v330_v12 = vmul.f32 %v536_v5, %v329_v8  ;;  %541 = vrsqrt.f32 %v95_v9  ;;  %vm105_vm7 = vmor %vm103_vm6, %vm104_vm4  ;;  %vm344_vm12 = vweird.f32 %v326_v10  ;;  %vm113_vm15 = vweird.f32 %v95_v9 }
 0x102   :  { %v99_v13 = vmul.f32 %v538_v7, %v98_v11  ;;  %543 = vrsqrt.f32 %v326_v10  ;;  %vm195_vm6 = vcmask 261120  }
 0x103   :  { %v331_v14 = vmul.f32 0.5, %v330_v12 }
 0x104   :  { %v100_v15 = vmul.f32 0.5, %v99_v13  ;;  %v90_v16 = vpop.xlane.xlu1 %89 }
 0x105   :  { %v332_v17 = vsub.f32 1.5, %v331_v14  ;;  %v93_v18 = vmul.f32 %v90_v16, %v631_v22 }
 0x106   :  { %v540_v19 = vpop.eup %539  ;;  %v101_v20 = vsub.f32 1.5, %v100_v15  ;;  %v530_v15 = vld [vmem:[%s860_s4] ss:$0 sm:$0xff] }
 0x107   :  { %v542_v21 = vpop.eup %541  ;;  %v349_v23 = vmul.f32 %v540_v19, %v327_v6  ;;  %v687_v24 = vadd.f32 1e-05, %v93_v18  ;;  %v333_v30 = vmul.f32 %v536_v5, %v332_v17  ;;  %vm355_vm10 = vweird.f32 %v540_v19 }
 0x108   :  { %v544_v25 = vpop.eup %543  ;;  %v102_v26 = vmul.f32 %v538_v7, %v101_v20  ;;  %v108_v27 = vmul.f32 %v542_v21, %v95_v9  ;;  %vm114_vm11 = vweird.f32 %v542_v21  ;;  %vm356_vm14 = vmor %vm354_vm9, %vm355_vm10 }
 0x109   :  { %v350_v31 = vmul.f32 %v540_v19, %v349_v23  ;;  %v339_v32 = vmul.f32 %v544_v25, %v326_v10  ;;  %545 = vrsqrt.f32 %v687_v24  ;;  %v337_v38 = vsel %vm690_vm8, %v536_v5, %v333_v30  ;;  %vm115_vm1 = vmor %vm113_vm15, %vm114_vm11 }
 0x10a   :  { %v109_v33 = vmul.f32 %v542_v21, %v108_v27  ;;  %v106_v36 = vsel %vm105_vm7, %v538_v7, %v102_v26  ;;  %vm345_vm13 = vweird.f32 %v544_v25  ;;  %v358_v51 = vmul.f32 %v337_v38, %v635_v28  ;;  %v529_v28 = vld [vmem:[%s859_s2] ss:$0 sm:$0xff] }
 0x10b   :  { %v351_v22 = vmul.f32 0.5, %v350_v31  ;;  %v340_v34 = vmul.f32 %v544_v25, %v339_v32  ;;  %v127_v45 = vmul.f32 %v106_v36, %v637_v29  ;;  %vm346_vm2 = vmor %vm344_vm12, %vm345_vm13  ;;  %vm123_vm4 = vweird.f32 %v687_v24 }
 0x10c   :  { %v110_v37 = vmul.f32 0.5, %v109_v33  ;;  %v361_v62 = vmul.f32 %v528_v48, %v358_v51 }
 0x10d   :  { %v352_v39 = vsub.f32 1.5, %v351_v22  ;;  %v341_v42 = vmul.f32 0.5, %v340_v34  ;;  %v133_v60 = vmul.f32 %v528_v48, %v127_v45 }
 0x10e   :  { %v111_v44 = vsub.f32 1.5, %v110_v37  ;;  %v562_v37 = vmov 32.0  }
 0x10f   :  { %v353_v46 = vmul.f32 %v540_v19, %v352_v39  ;;  %v342_v47 = vsub.f32 1.5, %v341_v42  ;;  %v546_v50 = vpop.eup %545  ;;  %547 = vrcp.f32 %v562_v37 }
 0x110   :  { %v112_v52 = vmul.f32 %v542_v21, %v111_v44  ;;  %v118_v55 = vmul.f32 %v546_v50, %v687_v24  ;;  %vm124_vm3 = vweird.f32 %v546_v50 }
 0x111   :  { %v357_v53 = vsel %vm356_vm14, %v540_v19, %v353_v46  ;;  %v343_v54 = vmul.f32 %v544_v25, %v342_v47  ;;  %vm125_vm5 = vmor %vm123_vm4, %vm124_vm3 }
 0x112   :  { %v116_v29 = vsel %vm115_vm1, %v542_v21, %v112_v52  ;;  %v360_v56 = vmul.f32 %v357_v53, %v650_v41  ;;  %v119_v59 = vmul.f32 %v546_v50, %v118_v55  ;;  %v139_v41 = vadd.f32 %v529_v28, %v133_v60 }
 0x113   :  { %v128_v57 = vmul.f32 %v116_v29, %v653_v43  ;;  %v347_v58 = vsel %vm346_vm2, %v544_v25, %v343_v54  ;;  %v364_v43 = vadd.f32 %v529_v28, %v361_v62 }
 0x114   :  { %v359_v61 = vmul.f32 %v347_v58, %v648_v40  ;;  %v363_v63 = vmul.f32 %v528_v48, %v360_v56  ;;  %v120_v0 = vmul.f32 0.5, %v119_v59 }
 0x115   :  { %v134_v1 = vmul.f32 %v528_v48, %v128_v57  ;;  %v548_v38 = vpop.eup %547 }
 0x116   :  { %v362_v2 = vmul.f32 %v528_v48, %v359_v61  ;;  %v366_v3 = vadd.f32 %v529_v28, %v363_v63  ;;  %v121_v4 = vsub.f32 1.5, %v120_v0  ;;  %v207_v39 = vmul.f32 32.0, %v548_v38 }
 0x117   :  { %v140_v5 = vadd.f32 %v529_v28, %v134_v1  ;;  %vm211_vm7 = vweird.f32 %v548_v38 }
 0x118   :  { %v365_v6 = vadd.f32 %v529_v28, %v362_v2  ;;  %v368_v7 = vpack.c.bf16 %v366_v3, %v366_v3  ;;  %v122_v8 = vmul.f32 %v546_v50, %v121_v4  ;;  %v208_v42 = vsub.f32 1.0, %v207_v39 }
 0x119   :  { %v142_v9 = vpack.c.bf16 %v140_v5, %v139_v41 }
 0x11a   :  { %v367_v10 = vpack.c.bf16 %v365_v6, %v364_v43  ;;  %505 = vmatmul.msk.bf16.vlgmr.msra.gmra.mxu3 %vm55_vm0, %v368_v7  ;;  %v126_v40 = vsel %vm125_vm5, %v546_v50, %v122_v8  ;;  %v209_v44 = vmul.f32 %v548_v38, %v208_v42 }
 0x11b   :  { %499 = vmatmul.msk.bf16.vlgmr.msra.gmra.mxu0 %vm55_vm0, %v142_v9  ;;  %v129_v11 = vmul.f32 %v126_v40, %v663_v49 }
 0x11c   :  { %504 = vmatmul.msk.bf16.vlgmr.msra.gmra.mxu1 %vm55_vm0, %v367_v10  ;;  %v210_v45 = vadd.f32 %v548_v38, %v209_v44 }
 0x11d   :  { %v135_v12 = vmul.f32 %v528_v48, %v129_v11 }
 0x11e   :  { %v725_v46 = vsel %vm211_vm7, %v548_v38, %v210_v45  ;;  %v780_v45 = vld [vmem:[%s862_s5] ss:$0 sm:$0xff] }
 0x11f   :  { %v141_v13 = vadd.f32 %v529_v28, %v135_v12 }
 0x121   :  { %v143_v14 = vpack.c.bf16 %v141_v13, %v141_v13 }
 0x123   :  { %500 = vmatmul.msk.bf16.vlgmr.msra.gmra.mxu2 %vm55_vm0, %v143_v14  ;;  %vm202_vm0 = vcmask 253952  }
 0x198   :  { %v186_v16 = vpop.f32.mrf.mxu0 }
 0x199   :  { %v187_v17 = vadd.f32 %v530_v15, %v186_v16  ;;  %v384_v18 = vpop.f32.mrf.mxu1 }
 0x19a   :  { %v385_v19 = vadd.f32 %v530_v15, %v384_v18 }
 0x19b   :  { %v196_v20 = vsel %vm195_vm6, %v187_v17, 0.0 }
 0x19c   :  { %197 = vadd.xlane.f32.xlu0 %v196_v20  ;;  %v393_v21 = vsel %vm195_vm6, %v385_v19, 0.0 }
 0x19d   :  { %394 = vadd.xlane.f32.xlu1 %v393_v21  ;;  %v389_v49 = vpop.f32.mrf.mxu3 }
 0x19e   :  { %v390_v32 = vadd.f32 %v530_v15, %v389_v49 }
 0x1a0   :  { %v188_v23 = vpop.f32.mrf.mxu0  ;;  %v399_v35 = vsel %vm202_vm0, %v390_v32, 0.0 }
 0x1a1   :  { %v189_v24 = vadd.f32 %v530_v15, %v188_v23  ;;  %v386_v25 = vpop.f32.mrf.mxu1 }
 0x1a2   :  { %v387_v26 = vadd.f32 %v530_v15, %v386_v25 }
 0x1a3   :  { %v199_v27 = vsel %vm195_vm6, %v189_v24, 0.0 }
 0x1a4   :  { %200 = vadd.xlane.f32.xlu2 %v199_v27  ;;  %v396_v30 = vsel %vm195_vm6, %v387_v26, 0.0 }
 0x1a5   :  { %397 = vadd.xlane.f32.xlu1 %v396_v30  ;;  %v391_v31 = vpop.f32.mrf.mxu3 }
 0x1a6   :  { %v191_v33 = vpop.f32.mrf.mxu2 }
 0x1a7   :  { %v192_v22 = vadd.f32 %v530_v15, %v191_v33 }
 0x1a9   :  { %v203_v34 = vsel %vm202_vm0, %v192_v22, 0.0 }
 0x1aa   :  { %204 = vadd.xlane.f32.xlu0 %v203_v34 }
 0x1ac   :  { %400 = vadd.xlane.f32.xlu2 %v399_v35 }
 0x1ae   :  { %v193_v36 = vpop.f32.mrf.mxu2 }
 0x20f   :  { %v198_v47 = vpop.xlane.xlu0 %197 }
 0x210   :  { %v395_v48 = vpop.xlane.xlu1 %394  ;;  %v213_v50 = vmul.f32 %v725_v46, %v198_v47 }
 0x211   :  { %v402_v51 = vmul.f32 %v395_v48, %v725_v46 }
 0x212   :  { %v729_v52 = vsub.f32 %v187_v17, %v213_v50 }
 0x213   :  { %v731_v53 = vsub.f32 %v385_v19, %v402_v51  ;;  %v787_v51 = vld [vmem:[%s863_s6] ss:$0 sm:$0xff] }
 0x214   :  { %v219_v54 = vmul.f32 %v729_v52, %v729_v52 }
 0x215   :  { %v408_v55 = vmul.f32 %v731_v53, %v731_v53 }
 0x216   :  { %v222_v29 = vsel %vm195_vm6, %v219_v54, 0.0 }
 0x217   :  { %v201_v56 = vpop.xlane.xlu2 %200  ;;  %v411_v57 = vsel %vm195_vm6, %v408_v55, 0.0  ;;  %223 = vadd.xlane.f32.xlu0 %v222_v29 }
 0x218   :  { %v214_v58 = vmul.f32 %v725_v46, %v201_v56  ;;  %412 = vadd.xlane.f32.xlu1 %v411_v57  ;;  %v398_v59 = vpop.xlane.xlu1 %397 }
 0x219   :  { %v403_v60 = vmul.f32 %v398_v59, %v725_v46 }
 0x21a   :  { %v741_v28 = vsub.f32 %v189_v24, %v214_v58 }
 0x21b   :  { %v743_v61 = vsub.f32 %v387_v26, %v403_v60 }
 0x21c   :  { %v220_v62 = vmul.f32 %v741_v28, %v741_v28 }
 0x21d   :  { %v409_v63 = vmul.f32 %v743_v61, %v743_v61  ;;  %v205_v0 = vpop.xlane.xlu0 %204 }
 0x21e   :  { %v225_v1 = vsel %vm195_vm6, %v220_v62, 0.0  ;;  %v215_v2 = vmul.f32 %v725_v46, %v205_v0  ;;  %v33_v62 = vld [vmem:[%s864_s7] sm:$0xff] }
 0x21f   :  { %226 = vadd.xlane.f32.xlu2 %v225_v1  ;;  %v401_v3 = vpop.xlane.xlu2 %400  ;;  %v414_v4 = vsel %vm195_vm6, %v409_v63, 0.0 }
 0x220   :  { %v404_v41 = vmul.f32 %v401_v3, %v725_v46  ;;  %415 = vadd.xlane.f32.xlu1 %v414_v4  ;;  %v753_v5 = vsub.f32 %v192_v22, %v215_v2 }
 0x222   :  { %v755_v43 = vsub.f32 %v390_v32, %v404_v41  ;;  %v221_v6 = vmul.f32 %v753_v5, %v753_v5 }
 0x224   :  { %v410_v7 = vmul.f32 %v755_v43, %v755_v43  ;;  %v228_v8 = vsel %vm202_vm0, %v221_v6, 0.0 }
 0x225   :  { %229 = vadd.xlane.f32.xlu0 %v228_v8 }
 0x226   :  { %v417_v9 = vsel %vm202_vm0, %v410_v7, 0.0 }
 0x227   :  { %418 = vadd.xlane.f32.xlu2 %v417_v9  ;;  %v476_v9 = vld [vmem:[%s865_s8] sm:$0x1] }
 0x28a   :  { %v224_v10 = vpop.xlane.xlu0 %223 }
 0x28b   :  { %v413_v40 = vpop.xlane.xlu1 %412  ;;  %v231_v11 = vmul.f32 %v224_v10, %v725_v46 }
 0x28c   :  { %v420_v12 = vmul.f32 %v413_v40, %v725_v46 }
 0x28d   :  { %v234_v13 = vadd.f32 1e-05, %v231_v11 }
 0x28e   :  { %v423_v14 = vadd.f32 1e-05, %v420_v12 }
 0x28f   :  { %549 = vrsqrt.f32 %v234_v13  ;;  %vm243_vm10 = vweird.f32 %v234_v13 }
 0x290   :  { %551 = vrsqrt.f32 %v423_v14  ;;  %vm432_vm11 = vweird.f32 %v423_v14 }
 0x292   :  { %v227_v15 = vpop.xlane.xlu2 %226 }
 0x293   :  { %v232_v16 = vmul.f32 %v227_v15, %v725_v46  ;;  %v416_v17 = vpop.xlane.xlu1 %415 }
 0x294   :  { %v421_v18 = vmul.f32 %v416_v17, %v725_v46 }
 0x295   :  { %v550_v19 = vpop.eup %549  ;;  %v235_v20 = vadd.f32 1e-05, %v232_v16 }
 0x296   :  { %v552_v21 = vpop.eup %551  ;;  %v238_v49 = vmul.f32 %v550_v19, %v234_v13  ;;  %v767_v23 = vadd.f32 1e-05, %v421_v18  ;;  %vm244_vm8 = vweird.f32 %v550_v19  ;;  %v34_v18 = vld [vmem:[%s864_s7 + $0x8] sm:$0xff] }
 0x297   :  { %v427_v24 = vmul.f32 %v552_v21, %v423_v14  ;;  %553 = vrsqrt.f32 %v235_v20  ;;  %vm433_vm9 = vweird.f32 %v552_v21  ;;  %vm245_vm12 = vmor %vm243_vm10, %vm244_vm8  ;;  %vm253_vm1 = vweird.f32 %v235_v20 }
 0x298   :  { %v239_v25 = vmul.f32 %v550_v19, %v238_v49  ;;  %555 = vrsqrt.f32 %v767_v23  ;;  %v230_v27 = vpop.xlane.xlu0 %229  ;;  %vm434_vm13 = vmor %vm432_vm11, %vm433_vm9  ;;  %vm442_vm2 = vweird.f32 %v767_v23 }
 0x299   :  { %v428_v26 = vmul.f32 %v552_v21, %v427_v24  ;;  %v233_v31 = vmul.f32 %v230_v27, %v725_v46 }
 0x29a   :  { %v240_v30 = vmul.f32 0.5, %v239_v25  ;;  %v419_v32 = vpop.xlane.xlu2 %418 }
 0x29b   :  { %v429_v33 = vmul.f32 0.5, %v428_v26  ;;  %v422_v22 = vmul.f32 %v419_v32, %v725_v46  ;;  %v772_v35 = vadd.f32 1e-05, %v233_v31 }
 0x29c   :  { %v241_v34 = vsub.f32 1.5, %v240_v30 }
 0x29d   :  { %v554_v36 = vpop.eup %553  ;;  %v430_v37 = vsub.f32 1.5, %v429_v33  ;;  %v774_v38 = vadd.f32 1e-05, %v422_v22  ;;  %557 = vrsqrt.f32 %v772_v35  ;;  %vm263_vm7 = vweird.f32 %v772_v35 }
 0x29e   :  { %v556_v39 = vpop.eup %555  ;;  %v242_v42 = vmul.f32 %v550_v19, %v241_v34  ;;  %v248_v44 = vmul.f32 %v554_v36, %v235_v20  ;;  %vm254_vm14 = vweird.f32 %v554_v36 }
 0x29f   :  { %v431_v46 = vmul.f32 %v552_v21, %v430_v37  ;;  %v437_v47 = vmul.f32 %v556_v39, %v767_v23  ;;  %559 = vrsqrt.f32 %v774_v38  ;;  %vm443_vm15 = vweird.f32 %v556_v39  ;;  %vm255_vm3 = vmor %vm253_vm1, %vm254_vm14 }
 0x2a0   :  { %v246_v48 = vsel %vm245_vm12, %v550_v19, %v242_v42  ;;  %v249_v50 = vmul.f32 %v554_v36, %v248_v44  ;;  %vm444_vm4 = vmor %vm442_vm2, %vm443_vm15  ;;  %vm452_vm10 = vweird.f32 %v774_v38 }
 0x2a1   :  { %v435_v54 = vsel %vm434_vm13, %v552_v21, %v431_v46  ;;  %v267_v55 = vmul.f32 %v246_v48, %v729_v52  ;;  %v438_v29 = vmul.f32 %v556_v39, %v437_v47 }
 0x2a2   :  { %v456_v56 = vmul.f32 %v435_v54, %v731_v53  ;;  %v250_v57 = vmul.f32 0.5, %v249_v50 }
 0x2a3   :  { %v273_v58 = vmul.f32 %v780_v45, %v267_v55  ;;  %v439_v59 = vmul.f32 0.5, %v438_v29  ;;  %v558_v60 = vpop.eup %557 }
 0x2a4   :  { %v459_v63 = vmul.f32 %v780_v45, %v456_v56  ;;  %v251_v0 = vsub.f32 1.5, %v250_v57  ;;  %v258_v52 = vmul.f32 %v558_v60, %v772_v35  ;;  %vm264_vm5 = vweird.f32 %v558_v60 }
 0x2a5   :  { %v279_v1 = vadd.f32 %v787_v51, %v273_v58  ;;  %v440_v2 = vsub.f32 1.5, %v439_v59  ;;  %v560_v53 = vpop.eup %559  ;;  %vm265_vm9 = vmor %vm263_vm7, %vm264_vm5 }
 0x2a6   :  { %v462_v3 = vadd.f32 %v787_v51, %v459_v63  ;;  %v252_v4 = vmul.f32 %v554_v36, %v251_v0  ;;  %v259_v7 = vmul.f32 %v558_v60, %v258_v52  ;;  %v447_v8 = vmul.f32 %v560_v53, %v774_v38 }
 0x2a7   :  { %v282_v41 = vadd.f32 %v279_v1, %v33_v62  ;;  %v441_v6 = vmul.f32 %v556_v39, %v440_v2  ;;  %vm453_vm8 = vweird.f32 %v560_v53 }
 0x2a8   :  { %v465_v10 = vadd.f32 %v462_v3, %v33_v62  ;;  %v256_v40 = vsel %vm255_vm3, %v554_v36, %v252_v4  ;;  %v260_v13 = vmul.f32 0.5, %v259_v7  ;;  %v448_v14 = vmul.f32 %v560_v53, %v447_v8  ;;  %vm454_vm11 = vmor %vm452_vm10, %vm453_vm8 }
 0x2a9   :  { %285 = vst.msk [vmem:[%s866_s9] sm:$0xff] %vm195_vm6, %v282_v41  ;;  %v268_v11 = vmul.f32 %v256_v40, %v741_v28  ;;  %v445_v12 = vsel %vm444_vm4, %v556_v39, %v441_v6 }
 0x2aa   :  { %506 = vst.msk [vmem:[%s866_s9 + $0x18] sm:$0xff] %vm195_vm6, %v465_v10  ;;  %v457_v15 = vmul.f32 %v445_v12, %v743_v61  ;;  %v261_v17 = vsub.f32 1.5, %v260_v13  ;;  %v449_v28 = vmul.f32 0.5, %v448_v14 }
 0x2ab   :  { %509 = vst.msk [vmem:[%s866_s9 + $0x18] sm:$0x1] %vm202_vm0, %v476_v9  ;;  %v274_v16 = vmul.f32 %v780_v45, %v268_v11 }
 0x2ac   :  { %477 = vst.msk [vmem:[%s866_s9] sm:$0x1] %vm202_vm0, %v476_v9  ;;  %v460_v61 = vmul.f32 %v780_v45, %v457_v15  ;;  %v262_v20 = vmul.f32 %v558_v60, %v261_v17  ;;  %v450_v21 = vsub.f32 1.5, %v449_v28 }
 0x2ad   :  { %v280_v19 = vadd.f32 %v787_v51, %v274_v16 }
 0x2ae   :  { %v463_v49 = vadd.f32 %v787_v51, %v460_v61  ;;  %v266_v24 = vsel %vm265_vm9, %v558_v60, %v262_v20  ;;  %v451_v25 = vmul.f32 %v560_v53, %v450_v21 }
 0x2af   :  { %v283_v23 = vadd.f32 %v280_v19, %v34_v18  ;;  %v269_v27 = vmul.f32 %v266_v24, %v753_v5  ;;  %v35_v5 = vld [vmem:[%s864_s7 + $0x10] sm:$0x1] }
 0x2b0   :  { %v466_v26 = vadd.f32 %v463_v49, %v34_v18  ;;  %v455_v30 = vsel %vm454_vm11, %v560_v53, %v451_v25 }
 0x2b1   :  { %286 = vst.msk [vmem:[%s866_s9 + $0x8] sm:$0xff] %vm195_vm6, %v283_v23  ;;  %v275_v31 = vmul.f32 %v780_v45, %v269_v27  ;;  %v458_v32 = vmul.f32 %v455_v30, %v755_v43 }
 0x2b2   :  { %507 = vst.msk [vmem:[%s866_s9 + $0x20] sm:$0xff] %vm195_vm6, %v466_v26 }
 0x2b3   :  { %v281_v33 = vadd.f32 %v787_v51, %v275_v31  ;;  %v461_v22 = vmul.f32 %v780_v45, %v458_v32 }
 0x2b5   :  { %v284_v34 = vadd.f32 %v281_v33, %v35_v5  ;;  %v464_v35 = vadd.f32 %v787_v51, %v461_v22 }
 0x2b7   :  { %287 = vst.msk [vmem:[%s866_s9 + $0x10] sm:$0x1] %vm202_vm0, %v284_v34  ;;  %v467_v36 = vadd.f32 %v464_v35, %v35_v5 }
 0x2b9   :  { %508 = vst.msk [vmem:[%s866_s9 + $0x28] sm:$0x1] %vm202_vm0, %v467_v36 }

</bundles_post_ra>
